<compile_context>
chip_gen: v5e
topology: v5e:2x2
jax: 0.10.0
libtpu: 0.0.40
codegen_flags: <defaults>
</compile_context>

<pallas_src>
import functools

import jax
import jax.numpy as jnp
from jax.experimental import pallas as pl
from jax.experimental.pallas import tpu as pltpu


def _soft_ce_kernel(x_ref, t_ref, o_ref, *, n_rows, tile_n):
    """Per-tile partial soft-target cross-entropy.

    x_ref, t_ref: (tile_n, C) blocks; o_ref: (1, 1, 128) lane-dense block
    holding this tile's partial sum (broadcast across lanes).
    """
    x = x_ref[...].astype(jnp.float32)
    t = t_ref[...].astype(jnp.float32)

    # loss_row = (m + lse) * sum_c(t) - sum_c(t * x)   [algebraic log_softmax]
    m = jnp.max(x, axis=-1, keepdims=True)
    lse = jnp.log(jnp.sum(jnp.exp(x - m), axis=-1, keepdims=True))
    sum_t = jnp.sum(t, axis=-1, keepdims=True)
    sum_tx = jnp.sum(t * x, axis=-1, keepdims=True)
    per_row = (m + lse) * sum_t - sum_tx                      # (tile_n, 1)

    # Mask out-of-range tail rows (their x/t contents are unspecified and may
    # produce NaN/Inf; they must not reach the partial sum).
    row_ids = jax.lax.broadcasted_iota(jnp.int32, (tile_n, 1), 0)
    valid = (pl.program_id(0) * tile_n + row_ids) < n_rows
    per_row = jnp.where(valid, per_row, 0.0)

    tile_sum = jnp.sum(per_row)                               # scalar
    o_ref[...] = jnp.broadcast_to(tile_sum, (1, 1, 128)).astype(jnp.float32)


def _round_up(a, b):
    return -(-a // b) * b


def _vmem_capacity_bytes():
    try:
        return int(pltpu.get_tpu_info().vmem_capacity_bytes)
    except Exception:
        return 64 * 1024 * 1024  # conservative: v7x-sized VMEM


def _per_row_vmem_bytes(c, in_itemsize):
    """VMEM bytes per batch row: 2 inputs x 2 pipeline buffers (input dtype,
    lane-padded) + ~3 f32 in-kernel temporaries."""
    c_pad = _round_up(c, 128)
    return c_pad * (4 * in_itemsize + 3 * 4)


def _choose_tile_n(n, c, in_itemsize, budget_bytes):
    """Largest sublane-aligned batch tile fitting the VMEM byte budget."""
    sublane = max(8, 32 // in_itemsize)         # 8 f32 / 16 bf16 / 32 int8 rows
    tile = max(1, budget_bytes // _per_row_vmem_bytes(c, in_itemsize))
    n_rounded = _round_up(n, sublane)
    tile = min(tile, n_rounded)                 # no bigger than (rounded) batch
    if n_rounded >= 2 * sublane:
        # Prefer >= 2 grid steps so both TensorCores get work on v7x megacore.
        half = _round_up((n + 1) // 2, sublane)
        tile = min(tile, half)
    tile = max(sublane, (tile // sublane) * sublane)
    return tile


def soft_target_cross_entropy(x, target, tile_n=None):
    """loss = mean( sum_c( -target * log_softmax(x, axis=-1) ) )."""
    assert x.shape == target.shape, (x.shape, target.shape)
    if x.ndim != 2:
        c_last = x.shape[-1]
        x = x.reshape(-1, c_last)
        target = target.reshape(-1, c_last)
    n, c = x.shape

    in_itemsize = max(jnp.dtype(x.dtype).itemsize, jnp.dtype(target.dtype).itemsize)
    vmem_cap = _vmem_capacity_bytes()
    # ~60% of physical VMEM for the working set; <=80 MiB even on 128 MiB parts.
    budget = max(16 * 1024 * 1024, min(int(vmem_cap * 0.6), 80 * 1024 * 1024))
    if tile_n is None:
        tile_n = _choose_tile_n(n, c, in_itemsize, budget)

    num_tiles = pl.cdiv(n, tile_n)

    # VMEM limit from the actual working set (+25% headroom), kept below the
    # physical capacity of the current generation.
    need = tile_n * _per_row_vmem_bytes(c, in_itemsize) + (1 << 20)
    vmem_limit = max(16 * 1024 * 1024,
                     min(int(need * 1.25), vmem_cap - 8 * 1024 * 1024))

    cost = pl.CostEstimate(
        flops=5 * n * c,
        transcendentals=n * c,
        bytes_accessed=n * c * (jnp.dtype(x.dtype).itemsize
                                + jnp.dtype(target.dtype).itemsize)
        + num_tiles * 128 * 4,
    )

    kernel = functools.partial(_soft_ce_kernel, n_rows=n, tile_n=tile_n)

    # TODO(synk): for vocabulary-scale C (>= ~32k) add a second grid axis over
    # C (reduction axis last, "arbitrary") with an online logsumexp so tile_n
    # stays large despite huge rows.
    per_tile = pl.pallas_call(
        kernel,
        out_shape=jax.ShapeDtypeStruct((num_tiles, 1, 128), jnp.float32),
        grid_spec=pltpu.PrefetchScalarGridSpec(
            num_scalar_prefetch=0,
            grid=(num_tiles,),
            in_specs=[
                pl.BlockSpec((tile_n, c), lambda i: (i, 0)),
                pl.BlockSpec((tile_n, c), lambda i: (i, 0)),
            ],
            out_specs=pl.BlockSpec((1, 1, 128), lambda i: (i, 0, 0)),
        ),
        compiler_params=pltpu.CompilerParams(
            dimension_semantics=("parallel",),
            vmem_limit_bytes=vmem_limit),
        cost_estimate=cost,
    )(x, target)

    # Tiny final reduction (num_tiles scalars) + divide by true row count.
    return jnp.sum(per_tile[:, 0, 0]) / jnp.float32(n)


def _reference(x, target):
    log_sm = jax.nn.log_softmax(x.astype(jnp.float32), axis=-1)
    loss = jnp.sum(-target.astype(jnp.float32) * log_sm, axis=-1)
    return jnp.mean(loss)


if __name__ == "__main__":
    key = jax.random.PRNGKey(0)
    k1, k2, k3, k4, k5, k6 = jax.random.split(key, 6)

    # Case 1: tile-divisible batch (2 grid steps -> exercises megacore split).
    N, C = 16, 32
    x = jax.random.normal(k1, (N, C), dtype=jnp.float32)
    target = jax.nn.softmax(jax.random.normal(k2, (N, C), dtype=jnp.float32), axis=-1)
    loss = jax.block_until_ready(soft_target_cross_entropy(x, target))
    ref = jax.block_until_ready(_reference(x, target))
    assert jnp.allclose(loss, ref, atol=1e-5, rtol=1e-5), (loss, ref)

    # Case 2: ragged batch (exercises the pad-free tail masking).
    N2, C2 = 13, 32
    x2 = jax.random.normal(k3, (N2, C2), dtype=jnp.float32)
    target2 = jax.nn.softmax(jax.random.normal(k4, (N2, C2), dtype=jnp.float32), axis=-1)
    loss2 = jax.block_until_ready(soft_target_cross_entropy(x2, target2))
    ref2 = jax.block_until_ready(_reference(x2, target2))
    assert jnp.allclose(loss2, ref2, atol=1e-5, rtol=1e-5), (loss2, ref2)

    # Case 3: >2-D input (leading dims flattened, mean over all rows).
    x3 = jax.random.normal(k5, (2, 3, 32), dtype=jnp.float32)
    target3 = jax.nn.softmax(jax.random.normal(k6, (2, 3, 32), dtype=jnp.float32), axis=-1)
    loss3 = jax.block_until_ready(soft_target_cross_entropy(x3, target3))
    ref3 = jax.block_until_ready(_reference(x3, target3))
    assert jnp.allclose(loss3, ref3, atol=1e-5, rtol=1e-5), (loss3, ref3)

    print("KERNEL_OK")
</pallas_src>

<mosaic_0001>
module attributes {stable_mosaic.version = 11 : i64} {
  func.func @_soft_ce_kernel(%arg0: i32, %arg1: memref<8x32xf32, #tpu.memory_space<vmem>>, %arg2: memref<8x32xf32, #tpu.memory_space<vmem>>, %arg3: memref<1x1x128xf32, #tpu.memory_space<vmem>>) attributes {dimension_semantics = [#tpu.dimension_semantics<parallel>], iteration_bounds = array<i64: 2>, scalar_prefetch = 0 : i64, scratch_operands = 0 : i64, tpu.core_type = #tpu.core_type<tc>, window_params = [{transform_indices = @transform_0, window_bounds = array<i64: 8, 32>}, {transform_indices = @transform_1, window_bounds = array<i64: 8, 32>}, {transform_indices = @transform_2, window_bounds = array<i64: 1, 1, 128>}]} {
    %c0 = arith.constant 0 : index
    %c0_0 = arith.constant 0 : index
    %0 = vector.load %arg1[%c0, %c0_0] : memref<8x32xf32, #tpu.memory_space<vmem>>, vector<8x32xf32>
    %c0_1 = arith.constant 0 : index
    %c0_2 = arith.constant 0 : index
    %1 = vector.load %arg2[%c0_1, %c0_2] : memref<8x32xf32, #tpu.memory_space<vmem>>, vector<8x32xf32>
    %cst = arith.constant dense<0xFF800000> : vector<8xf32>
    %2 = vector.multi_reduction <maximumf>, %0, %cst [1] : vector<8x32xf32> to vector<8xf32>
    %3 = vector.shape_cast %2 : vector<8xf32> to vector<8x1xf32>
    %4 = vector.broadcast %3 : vector<8x1xf32> to vector<8x32xf32>
    %5 = arith.subf %0, %4 : vector<8x32xf32>
    %6 = math.exp %5 : vector<8x32xf32>
    %cst_3 = arith.constant dense<0.000000e+00> : vector<8xf32>
    %7 = vector.multi_reduction <add>, %6, %cst_3 [1] : vector<8x32xf32> to vector<8xf32>
    %8 = vector.shape_cast %7 : vector<8xf32> to vector<8x1xf32>
    %9 = math.log %8 : vector<8x1xf32>
    %cst_4 = arith.constant dense<0.000000e+00> : vector<8xf32>
    %10 = vector.multi_reduction <add>, %1, %cst_4 [1] : vector<8x32xf32> to vector<8xf32>
    %11 = vector.shape_cast %10 : vector<8xf32> to vector<8x1xf32>
    %12 = arith.mulf %1, %0 : vector<8x32xf32>
    %cst_5 = arith.constant dense<0.000000e+00> : vector<8xf32>
    %13 = vector.multi_reduction <add>, %12, %cst_5 [1] : vector<8x32xf32> to vector<8xf32>
    %14 = vector.shape_cast %13 : vector<8xf32> to vector<8x1xf32>
    %15 = arith.addf %3, %9 : vector<8x1xf32>
    %16 = arith.mulf %15, %11 : vector<8x1xf32>
    %17 = arith.subf %16, %14 : vector<8x1xf32>
    %18 = tpu.iota {dimensions = array<i32: 0>} : vector<8x1xi32>
    %c8_i32 = arith.constant 8 : i32
    %19 = arith.muli %arg0, %c8_i32 : i32
    %20 = vector.broadcast %19 : i32 to vector<8x1xi32>
    %21 = arith.addi %20, %18 : vector<8x1xi32>
    %c16_i32 = arith.constant 16 : i32
    %22 = vector.broadcast %c16_i32 : i32 to vector<8x1xi32>
    %23 = arith.cmpi slt, %21, %22 : vector<8x1xi32>
    %cst_6 = arith.constant 0.000000e+00 : f32
    %24 = vector.broadcast %cst_6 : f32 to vector<8x1xf32>
    %25 = arith.select %23, %17, %24 : vector<8x1xi1>, vector<8x1xf32>
    %26 = vector.shape_cast %25 : vector<8x1xf32> to vector<1x8x1xf32>
    %cst_7 = arith.constant dense<0.000000e+00> : vector<1xf32>
    %27 = vector.multi_reduction <add>, %26, %cst_7 [1, 2] : vector<1x8x1xf32> to vector<1xf32>
    %28 = vector.shape_cast %27 : vector<1xf32> to vector<1x1x1xf32>
    %29 = vector.extract %28[0, 0, 0] : f32 from vector<1x1x1xf32>
    %30 = vector.broadcast %29 : f32 to vector<1x1x128xf32>
    %c0_8 = arith.constant 0 : index
    %c0_9 = arith.constant 0 : index
    %c0_10 = arith.constant 0 : index
    %31 = vector.load %arg3[%c0_8, %c0_9, %c0_10] : memref<1x1x128xf32, #tpu.memory_space<vmem>>, vector<1x1x128xf32>
    tpu.vector_store %arg3[%c0_8, %c0_9, %c0_10], %30 {strides = array<i32>} : memref<1x1x128xf32, #tpu.memory_space<vmem>>, vector<1x1x128xf32>,
    return
  }
  func.func @transform_0(%arg0: i32) -> (i32, i32) {
    %c0_i32 = arith.constant 0 : i32
    %c0_i32_0 = arith.constant 0 : i32
    return %arg0, %c0_i32 : i32, i32
  }
  func.func @transform_1(%arg0: i32) -> (i32, i32) {
    %c0_i32 = arith.constant 0 : i32
    %c0_i32_0 = arith.constant 0 : i32
    return %arg0, %c0_i32 : i32, i32
  }
  func.func @transform_2(%arg0: i32) -> (i32, i32, i32) {
    %c0_i32 = arith.constant 0 : i32
    %c0_i32_0 = arith.constant 0 : i32
    %c0_i32_1 = arith.constant 0 : i32
    return %arg0, %c0_i32, %c0_i32_0 : i32, i32, i32
  }
}

</mosaic_0001>

<bundles_post_ra>
// kernel: tpu_custom_call.1
= control target key start
LH: loop header
LB: loop body
LE: loop exit
PB: predicated region body
PF: predicated region fallthrough
CT: control target
= control target key end

     0   :  { %7 = vsyncpa [#allocation3], 0  ;;  %s724_s0 = inlined_call_operand.hbm [shape: f32[16,32], index: 0, kind: input, shape index: {}]   ;;  %s725_s1 = inlined_call_operand.hbm [shape: f32[16,32], index: 1, kind: input, shape index: {}]   ;;  %s726_s2 = inlined_call_operand.hbm [shape: f32[2,1,128], index: 2, kind: output, shape index: {}]  }
   0x1   :  { %9 = vsyncpa [#allocation3 + $0x1], 0 }
   0x2   :  { %10 = vsyncpa [#allocation6], 0 }
   0x3   :  { %12 = vsyncpa [#allocation6 + $0x1], 0 }
   0x4   :  { %13 = vsyncpa [#allocation4], 0 }
   0x5   :  { %15 = vsyncpa [#allocation4 + $0x1], 0  ;;  %s562_s9 = smov 0   ;;  %s564_s10 = smov 0  }
   0x6   :  { %s566_s11 = smov 0   ;;  %s568_s12 = smov 0  }
   0x7 LB: > { %s583_s13 = sadd.s32 4294967295, %s545_s12   ;;  %s345_s14 = sadd.s32 4294967294, %s545_s12   ;;  %s545_s12 = sphi %s568_s12, %s737_s12   ;;  %s541_s11 = sphi %s566_s11, %s736_s11   ;;  %s537_s10 = sphi %s564_s10, %s735_s10   ;;  %s533_s9 = sphi %s562_s9, %s734_s9  }
   0x8   : > { %s587_s15 = sadd.s32 1, %s545_s12   ;;  %s28_s16 = sadd.s32 1, %s541_s11 }
   0x9   : > { %s25_s17 = ssub.s32 %s545_s12, %s587_s15  ;;  %p35_p0 = scmp.ne.s32.totalorder %s541_s11, %s537_s10 }
   0xa   : > { %p26_p1 = scmp.eq.s32.totalorder %s25_s17, 0  ;;  %p36_p2 = scmp.eq.s32.totalorder %s545_s12, 0 }
   0xb   : > { %p41_p3 = scmp.ne.s32.totalorder %s537_s10, %s533_s9  ;;  %p42_p4 = scmp.eq.s32.totalorder %s583_s13, 0 }
   0xc   : > { %s599_s18 = scalar_select %p26_p1, %s541_s11, %s28_s16  }
   0xd   : > { %p601_p5 = por %p36_p2, %p35_p0  ;;  %p605_p6 = por %p42_p4, %p41_p3 }
   0xe   : > { %p91_p7 = scmp.eq.s32.totalorder %s583_s13, 1  ;;  %p97_p8 = scmp.eq.s32.totalorder %s345_s14, 1 }
   0xf   : > { %p377_p10 = scmp.lt.s32.totalorder %s545_s12, 2  ;;  %s621_s23 = sand.u32 1, %s541_s11  }
  0x10   : > { %p612_p11 = por %p91_p7, %p35_p0  ;;  %p616_p12 = por %p97_p8, %p41_p3 }
  0x11   : > { %s349_s24 = sshll.u32 %s545_s12, 3  ;;  %s348_s25 = sshll.u32 %s621_s23, 3 }
  0x12   : > { %s125_s28 = scalar_lea.hbm %s724_s0, %s349_s24  ;;  %s121_s30 = scalar_lea.vmem [#allocation2], %s348_s25 }
  0x13   : > { %s127_s29 = sshll.u32 %s125_s28, 4  ;;  %s129_s3 = sshll.u32 %s121_s30, 4  ;;  %s128_s29 = int_to_ptr.hbm [resolvable:$true] %s127_s29  ;;  %s130_s3 = int_to_ptr.vmem [resolvable:$true] %s129_s3 }
  0x14   : > { %p630_p13 = pnand %p377_p10, %p601_p5  ;;  %p352_p0 = scmp.ge.s32.totalorder %s545_s12, 1 }
  0x15   : > { %p153_p1 = scmp.lt.s32.totalorder %s545_s12, 3  ;;  %s118_s5 = scalar_lea.sflag [#allocation3], %s621_s23 }
  0x16   : > { %s415_s6 = sshra.s32 %s128_s29, 4  ;;  %p419_p3 = pneg %p630_p13  ;;  %s416_s6 = int_to_ptr.hbm [resolvable:$true] %s415_s6 }
  0x17   : > { %s417_s7 = scalar_lea.hbm %s416_s6, 8  ;;  %s422_s16 = scalar_lea.hbm %s724_s0, 16 }
  0x18   : > { %p418_p2 = scmp.ne.s32.totalorder %s416_s6, %s417_s7  ;;  %p423_p5 = scmp.lt.s32.totalorder %s416_s6, %s724_s0 }
  0x19   : > { %p424_p8 = scmp.lt.s32.totalorder %s422_s16, %s417_s7 }
  0x1a   : > { %p420_p4 = pnand %p419_p3, %p418_p2 }
  0x1b   : > { %p425_p10 = por %p424_p8, %p423_p5 }
  0x1c   : > { %p421_p7 = pneg %p420_p4 }
  0x1e   : > { %p426_p9 = pnand %p425_p10, %p421_p7 }
  0x20   : > { %429 = shalt.err (!%p426_p9)
}
  0x21   : > { %369 = dma.hbm_to_vmem [thread:$0]  (!%p630_p13), %s128_s29, 128, %s130_s3, %s118_s5  }
  0x22   : > { %p654_p2 = pnand %p352_p0, %p153_p1  ;;  %s144_s30 = scalar_lea.hbm %s725_s1, %s349_s24 }
  0x23   : > { %s146_s6 = sshll.u32 %s144_s30, 4  ;;  %s140_s7 = scalar_lea.vmem [#allocation5], %s348_s25  ;;  %s147_s6 = int_to_ptr.hbm [resolvable:$true] %s146_s6 }
  0x24   : > { %s148_s8 = sshll.u32 %s140_s7, 4  ;;  %s137_s14 = scalar_lea.sflag [#allocation6], %s621_s23  ;;  %s149_s8 = int_to_ptr.vmem [resolvable:$true] %s148_s8 }
  0x25   : > { %s445_s16 = sshra.s32 %s147_s6, 4  ;;  %s452_s5 = scalar_lea.hbm %s725_s1, 16  ;;  %s446_s16 = int_to_ptr.hbm [resolvable:$true] %s445_s16 }
  0x26   : > { %s447_s17 = scalar_lea.hbm %s446_s16, 8  ;;  %p453_p4 = scmp.lt.s32.totalorder %s446_s16, %s725_s1 }
  0x27   : > { %p448_p9 = scmp.ne.s32.totalorder %s446_s16, %s447_s17  ;;  %p454_p7 = scmp.lt.s32.totalorder %s452_s5, %s447_s17 }
  0x29   : > { %p450_p0 = pnand %p448_p9, %p419_p3  ;;  %p455_p5 = por %p454_p7, %p453_p4 }
  0x2b   : > { %p451_p1 = pneg %p450_p0 }
  0x2d   : > { %p456_p8 = pnand %p455_p5, %p451_p1 }
  0x2f   : > { %459 = shalt.err (!%p456_p8)
}
  0x30   : > { %372 = dma.hbm_to_vmem [thread:$0]  (!%p630_p13), %s147_s6, 128, %s149_s8, %s137_s14  }
  0x31   : > { %157 = sbr.rel (%p654_p2) target bundleno = 502 (0x1f6), region = 28  ;;  %s676_s23 = sand.u32 (!%p654_p2), 1, %s537_s10  }
  0x32   : > { %s353_s25 = sshll.u32 (!%p654_p2), %s676_s23, 3  ;;  %s160_s27 = scalar_lea.sflag (!%p654_p2), [#allocation3], %s676_s23 }
  0x33   : > { %s163_s28 = scalar_lea.vmem (!%p654_p2), [#allocation2], %s353_s25 }
  0x36   : > { %520 = dma.done.wait (%p605_p6), %s160_s27, 128  }
  0x37   : > { %522 = vsyncadd (%p605_p6), %s160_s27, 4294967168  ;;  %s170_s4 = scalar_lea.sflag [#allocation6], %s676_s23  ;;  %s173_s30 = scalar_lea.vmem [#allocation5], %s353_s25 }
  0x38   : > { %524 = dma.done.wait (%p605_p6), %s170_s4, 128  }
  0x39   : > { %526 = vsyncadd (%p605_p6), %s170_s4, 4294967168  ;;  %vm201_vm0 = vcmask 261120   ;;  %v199_v0 = vld [vmem:[%s163_s28] sm:$0xff]  ;;  %v200_v2 = vld [vmem:[%s173_s30] sm:$0xff]  ;;  %v223_v13 = vlaneseq  ;;  %s355_s20 = sshll.u32 %s583_s13, 3  ;;  %vm230_vm2 = vcmask 7168   ;;  %s252_s7 = scalar_lea.hbm %s726_s2, %s583_s13 }
  0x3a   : > { %v202_v1 = vsel %vm201_vm0, %v199_v0, -inf  ;;  %v213_v3 = vsel %vm201_vm0, %v200_v2, 0.0  ;;  %v216_v4 = vmul.f32 %v200_v2, %v199_v0  ;;  %v226_v15 = vstv %s355_s20  ;;  %s198_s8 = scalar_lea.vmem [#allocation7], %s676_s23  ;;  %s256_s16 = sshll.u32 %s252_s7, 4  ;;  %s257_s16 = int_to_ptr.hbm [resolvable:$true] %s256_s16 }
  0x3b   : > { %203 = vmax.xlane.f32.xlu0 %v202_v1  ;;  %214 = vadd.xlane.f32.xlu1 %v213_v3  ;;  %v224_v14 = vshrl.u32 %v223_v13, 7  ;;  %s254_s14 = sshll.u32 %s198_s8, 4  ;;  %s244_s29 = scalar_lea.sflag [#allocation4], %s676_s23  ;;  %s255_s14 = int_to_ptr.vmem [resolvable:$true] %s254_s14 }
  0x3c   : > { %v217_v5 = vsel %vm201_vm0, %v216_v4, 0.0  ;;  %s489_s3 = sshra.s32 %s257_s16, 4  ;;  %s495_s13 = scalar_lea.hbm %s726_s2, 2  ;;  %s490_s3 = int_to_ptr.hbm [resolvable:$true] %s489_s3 }
  0x3d   : > { %v227_v18 = vadd.s32 %v226_v15, %v224_v14  ;;  %s491_s5 = scalar_lea.hbm %s490_s3, 1  ;;  %p496_p10 = scmp.lt.s32.totalorder %s490_s3, %s726_s2 }
  0x3e   : > { %p492_p6 = scmp.ne.s32.totalorder %s490_s3, %s491_s5  ;;  %p497_p2 = scmp.lt.s32.totalorder %s495_s13, %s491_s5 }
  0x3f   : > { %vm228_vm1 = vcmp.lt.s32.totalorder %v227_v18, 16 }
  0x40   : > { %p493_p13 = pnand %p492_p6, %p612_p11  ;;  %p498_p9 = por %p497_p2, %p496_p10 }
  0x42   : > { %p494_p3 = pneg %p493_p13 }
  0x43   : > { %218 = vadd.xlane.f32.xlu1 %v217_v5 }
  0x44   : > { %p499_p0 = pnand %p498_p9, %p494_p3 }
  0xae   : > { %v204_v6 = vpop.xlane.xlu0 %203  ;;  %v215_v12 = vpop.xlane.xlu1 %214 }
  0xaf   : > { %v205_v7 = vsub.f32 %v199_v0, %v204_v6 }
  0xb1   : > { %v206_v8 = vmul.f32 1.442695, %v205_v7 }
  0xb3   : > { %411 = vpow2.f32 %v206_v8 }
  0xb6   : > { %v219_v20 = vpop.xlane.xlu1 %218 }
  0xb9   : > { %v412_v9 = vpop.eup %411 }
  0xba   : > { %v208_v10 = vsel %vm201_vm0, %v412_v9, 0.0 }
  0xbb   : > { %209 = vadd.xlane.f32.xlu0 %v208_v10 }
 0x12e   : > { %v210_v11 = vpop.xlane.xlu0 %209 }
 0x12f   : > { %413 = vlog2.f32 %v210_v11 }
 0x135   : > { %v414_v16 = vpop.eup %413 }
 0x136   : > { %v212_v17 = vmul.f32 0.6931472, %v414_v16 }
 0x138   : > { %v220_v19 = vadd.f32 %v212_v17, %v204_v6 }
 0x13a   : > { %v221_v21 = vmul.f32 %v220_v19, %v215_v12 }
 0x13c   : > { %v222_v22 = vsub.f32 %v221_v21, %v219_v20 }
 0x13e   : > { %v229_v23 = vsel %vm228_vm1, %v222_v22, 0.0 }
 0x13f   : > { %v231_v24 = vsel %vm230_vm2, %v229_v23, 0.0 }
 0x140   : > { %232 = vadd.xlane.f32.xlu2 %v231_v24 }
 0x1b3   : > { %v233_v25 = vpop.xlane.xlu2 %232 }
 0x1b4   : > { %v234_v26 = vrot.slane %v233_v25, 4 }
 0x1b6   : > { %v235_v27 = vadd.f32 %v234_v26, %v233_v25 }
 0x1b8   : > { %v236_v28 = vrot.slane %v235_v27, 2 }
 0x1ba   : > { %v237_v29 = vadd.f32 %v236_v28, %v235_v27 }
 0x1bc   : > { %v238_v30 = vrot.slane %v237_v29, 1 }
 0x1be   : > { %v239_v31 = vadd.f32 %v238_v30, %v237_v29 }
 0x1c0   : > { %358 = vpush %v239_v31 }
 0x1f1   : > { %s359_s17 = spop %358 }
 0x1f2   : > { %v241_v32 = vstv %s359_s17 }
 0x1f3   : > { %242 = vst [vmem:[%s198_s8] sm:$0x1] %v241_v32 }
 0x1f4   : > { %502 = shalt.err (!%p499_p0)
}
 0x1f5   : > { %364 = dma.vmem_to_hbm [thread:$0]  (%p612_p11), %s255_s14, 16, %s257_s16, %s244_s29  }
 0x1f6 PF: > { %s268_s23 = sand.u32 1, %s533_s9   ;;  %p733_p1 = scmp.ge.s32.totalorder %s545_s12, 2 }
 0x1f7   : > { %s269_s28 = scalar_lea.sflag [#allocation4], %s268_s23 }
 0x1f8   : > { %p374_p4 = pnand %p733_p1, %p616_p12 }
 0x1fa   : > { %p375_p7 = pneg %p374_p4 }
 0x1fc   : > { %528 = dma.done.wait (%p375_p7), %s269_s28, 16  }
 0x1fd   : > { %530 = vsyncadd (%p375_p7), %s269_s28, 4294967280  ;;  %p18_p5 = scmp.ge.s32.totalorder %s587_s15, 4   ;;  %s734_s9 = smov %s537_s10 }
 0x1fe   : > { %s735_s10 = smov %s541_s11  ;;  %s736_s11 = smov %s599_s18 }
 0x1ff   : > { %s737_s12 = smov %s587_s15  ;;  %20 = sbr.rel (!%p18_p5) target bundleno = 7 (0x7), region = 86 }
 0x204   :  { %274 = vsyncpa [#allocation3], 1 }
 0x205   :  { %276 = vsyncpa [#allocation3 + $0x1], 1 }
 0x206   :  { %277 = vsyncpa [#allocation6], 1 }
 0x207   :  { %279 = vsyncpa [#allocation6 + $0x1], 1 }
 0x208   :  { %280 = vsyncpa [#allocation4], 1 }
 0x209   :  { %282 = vsyncpa [#allocation4 + $0x1], 1 }

</bundles_post_ra>
